<compile_context>
chip_gen: v6e
topology: v6e:2x2x1
jax: 0.10.0
libtpu: 0.0.40
codegen_flags: <defaults>
</compile_context>

<pallas_src>
import functools

import numpy as np
import jax
import jax.numpy as jnp
from jax.experimental import pallas as pl
from jax.experimental.pallas import tpu as pltpu


# ----------------------------------------------------------------------------
# Kernel
# ----------------------------------------------------------------------------
def positional_encoder_kernel(x_ref, pe_ref, out_ref, *, scale, upcast):
    # x_ref:  (TB, TL)   rows of the batch, fused (seq*d_model) lane axis
    # pe_ref: (1,  TL)   positional-encoding slab, broadcast over rows (VPU)
    x = x_ref[...]
    pe = pe_ref[...]
    if upcast:                      # only for sub-32-bit dtypes on v5e
        x = x.astype(jnp.float32)
        pe = pe.astype(jnp.float32)
    out_ref[...] = (scale * x + pe).astype(out_ref.dtype)


# ----------------------------------------------------------------------------
# Host-side tile selection (joint VMEM budget, per-generation)
# ----------------------------------------------------------------------------
_LANE = 128
_TARGET_BLOCK_BYTES = 2 << 20      # ~2 MiB per x block: roofline already ~85%+
_TINY_BYTES = 1 << 20              # below this, plain XLA fusion wins


def _tpu_info():
    try:
        return pltpu.get_tpu_info()
    except Exception:
        return None


def _vmem_budget_bytes():
    """Total live-VMEM budget for this kernel's buffers."""
    info = _tpu_info()
    if info is not None:
        try:
            cap = int(info.vmem_capacity_bytes)
            return min(cap // 2, 48 << 20)   # e.g. <=32 MiB on v7x (64 MiB phys)
        except Exception:
            pass
    return 32 << 20                           # safe default for v5e/v6e/v7x


def _prefers_f32_compute():
    """True on v5e (no bf16 VALU) or when the chip can't be identified."""
    info = _tpu_info()
    if info is None:
        return True
    name = str(getattr(info, "chip_version", "")).lower()
    return "v5" in name or "5e" in name


def _sublane_align(itemsize):
    # f32 -> 8, bf16 -> 16 (sublane packing), int8 -> 32
    return max(8 * (4 // max(itemsize, 1)), 8)


def _select_tiles(B, SD, itemsize, budget):
    # Lane tile: multiple of 128 (or the full fused axis if not 128-divisible:
    # block_shape last dim must divide by 128 or equal the array dim).
    if SD % _LANE != 0:
        tl = SD
    else:
        tl = min(SD, 4096)

    # Row tile from the joint budget:
    #   live ~= 2*x_block + 2*out_block + 2*pe_block   (all double-buffered)
    block_budget = max(min(_TARGET_BLOCK_BYTES, budget // 6), _LANE * itemsize)
    sub = _sublane_align(itemsize)
    if B <= sub:
        tb = B                                   # full dim is always legal
    else:
        rows = block_budget // (tl * itemsize)
        tb = max((min(rows, B) // sub) * sub, sub)

    # v7x has 2 TensorCores: make sure a non-tiny problem has >=2 grid steps
    # along a parallel axis so both cores' DMA engines stream concurrently.
    total_bytes = B * SD * itemsize
    if pl.cdiv(B, tb) * pl.cdiv(SD, tl) < 2 and total_bytes > (4 << 20):
        if tl % (2 * _LANE) == 0 and tl > _LANE:
            tl //= 2
        elif tb % (2 * sub) == 0 and tb > sub:
            tb //= 2
    return tb, tl


# ----------------------------------------------------------------------------
# Host wrapper
# ----------------------------------------------------------------------------
def positional_encoder(x, pe, *, force_pallas=False, donate_x=False):
    """x: (B, S, D).  pe: (1, max_seq_len, D) with max_seq_len >= S."""
    B, S, D = x.shape
    assert pe.ndim == 3 and pe.shape[0] == 1 and pe.shape[2] == D
    assert pe.shape[1] >= S
    pe = pe[:, :S, :].astype(x.dtype)
    scale = float(np.sqrt(D))                  # sqrt(d_model), compile-time const

    itemsize = jnp.dtype(x.dtype).itemsize
    total_bytes = B * S * D * itemsize

    # Tiny inputs: pallas_call launch/pipeline setup dwarfs the memory time;
    # let XLA fuse the FMA with its neighbours instead.
    if total_bytes < _TINY_BYTES and not force_pallas:
        return (scale * x + pe).astype(x.dtype)

    SD = S * D
    xf = x.reshape(B, SD)                      # lane-dense fused axis (no copy)
    pef = pe.reshape(1, SD)

    budget = _vmem_budget_bytes()
    tb, tl = _select_tiles(B, SD, itemsize, budget)
    n_i = pl.cdiv(B, tb)                       # batch-row tiles (inner axis)
    n_j = pl.cdiv(SD, tl)                      # lane-chunk tiles (outer axis)

    # Explicit scoped-VMEM limit matching the tile footprint (+ headroom).
    live = 2 * (2 * tb * tl + tl) * itemsize   # dbl-buffered x, out, pe
    vmem_limit = int(min(max(2 * live, 8 << 20), budget))

    upcast = itemsize < 4 and _prefers_f32_compute()
    kernel = functools.partial(positional_encoder_kernel,
                               scale=scale, upcast=upcast)

    out = pl.pallas_call(
        kernel,
        out_shape=jax.ShapeDtypeStruct((B, SD), x.dtype),
        grid_spec=pltpu.PrefetchScalarGridSpec(
            num_scalar_prefetch=0,
            # Lane-chunk axis OUTER, batch-row axis INNER: pe's block index
            # (0, j) is constant across consecutive inner steps, so Pallas
            # skips re-fetching the PE slab for every batch tile.
            grid=(n_j, n_i),
            in_specs=[
                pl.BlockSpec((tb, tl), lambda j, i: (i, j)),   # x rows
                pl.BlockSpec((1, tl), lambda j, i: (0, j)),    # pe (row-bcast)
            ],
            out_specs=pl.BlockSpec((tb, tl), lambda j, i: (i, j)),
        ),
        compiler_params=pltpu.CompilerParams(
            dimension_semantics=("parallel", "parallel"),
            vmem_limit_bytes=vmem_limit,
        ),
        input_output_aliases=({0: 0} if donate_x else {}),
    )(xf, pef)

    return out.reshape(B, S, D)


# ----------------------------------------------------------------------------
# PE table: faithful replication of the PyTorch constructor's double loop
# (quirk preserved: the cos written at column i+2 is clobbered by the next
#  iteration's sin, so odd columns are 0 and only the last cos survives).
# ----------------------------------------------------------------------------
def make_positional_encoding(d_model, max_seq_len):
    pe = np.zeros((max_seq_len, d_model), dtype=np.float32)
    for pos in range(max_seq_len):
        for i in range(0, d_model - 2, 2):
            pe[pos, i] = np.sin(pos / 10000 ** (2 * i / d_model))
            pe[pos, i + 2] = np.cos(pos / 10000 ** (2 * (i + 1) / d_model))
    return jnp.asarray(pe)[None]               # (1, max_seq_len, d_model)


def _reference(x, pe):
    """Pure-JAX reference of the PyTorch forward."""
    B, S, D = x.shape
    return float(np.sqrt(D)) * x + pe[:, :S, :].astype(x.dtype)


# ----------------------------------------------------------------------------
if __name__ == "__main__":
    key = jax.random.PRNGKey(0)
    k1, k2 = jax.random.split(key)

    # Toy shape implied by the module (batch=2, seq=8, d_model=32). Force the
    # Pallas path so the kernel itself is exercised (the default wrapper would
    # route a shape this small through plain XLA).
    B, S, D = 2, 8, 32
    x_small = jax.random.normal(k1, (B, S, D), dtype=jnp.float32)
    pe_small = make_positional_encoding(D, S)
    out_small = jax.block_until_ready(
        positional_encoder(x_small, pe_small, force_pallas=True))
    ref_small = jax.block_until_ready(_reference(x_small, pe_small))
    assert out_small.shape == (B, S, D)
    assert jnp.allclose(out_small, ref_small, rtol=1e-5, atol=1e-5)

    # Mid-size shape: exercises the real multi-step tiling, the PE-resident
    # grid ordering, and the multi-step parallel grid (v7x dual-TC path).
    B2, S2, D2 = 16, 256, 256
    x_mid = jax.random.normal(k2, (B2, S2, D2), dtype=jnp.float32)
    pe_mid = make_positional_encoding(D2, S2)
    out_mid = jax.block_until_ready(positional_encoder(x_mid, pe_mid))
    ref_mid = jax.block_until_ready(_reference(x_mid, pe_mid))
    assert jnp.allclose(out_mid, ref_mid, rtol=1e-5, atol=1e-5)

    print("KERNEL_OK")
</pallas_src>

<mosaic_0001>
module attributes {stable_mosaic.version = 11 : i64} {
  func.func @positional_encoder_kernel(%arg0: i32, %arg1: i32, %arg2: memref<2x256xf32, #tpu.memory_space<vmem>>, %arg3: memref<1x256xf32, #tpu.memory_space<vmem>>, %arg4: memref<2x256xf32, #tpu.memory_space<vmem>>) attributes {dimension_semantics = [#tpu.dimension_semantics<parallel>, #tpu.dimension_semantics<parallel>], iteration_bounds = array<i64: 1, 1>, scalar_prefetch = 0 : i64, scratch_operands = 0 : i64, tpu.core_type = #tpu.core_type<tc>, window_params = [{transform_indices = @transform_0, window_bounds = array<i64: 2, 256>}, {transform_indices = @transform_1, window_bounds = array<i64: 1, 256>}, {transform_indices = @transform_2, window_bounds = array<i64: 2, 256>}]} {
    %c0 = arith.constant 0 : index
    %c0_0 = arith.constant 0 : index
    %0 = vector.load %arg2[%c0, %c0_0] : memref<2x256xf32, #tpu.memory_space<vmem>>, vector<2x256xf32>
    %c0_1 = arith.constant 0 : index
    %c0_2 = arith.constant 0 : index
    %1 = vector.load %arg3[%c0_1, %c0_2] : memref<1x256xf32, #tpu.memory_space<vmem>>, vector<1x256xf32>
    %cst = arith.constant 5.65685415 : f32
    %2 = vector.broadcast %cst : f32 to vector<2x256xf32>
    %3 = arith.mulf %2, %0 : vector<2x256xf32>
    %4 = vector.broadcast %1 : vector<1x256xf32> to vector<2x256xf32>
    %5 = arith.addf %3, %4 : vector<2x256xf32>
    %c0_3 = arith.constant 0 : index
    %c0_4 = arith.constant 0 : index
    %6 = vector.load %arg4[%c0_3, %c0_4] : memref<2x256xf32, #tpu.memory_space<vmem>>, vector<2x256xf32>
    tpu.vector_store %arg4[%c0_3, %c0_4], %5 {strides = array<i32>} : memref<2x256xf32, #tpu.memory_space<vmem>>, vector<2x256xf32>,
    return
  }
  func.func @transform_0(%arg0: i32, %arg1: i32) -> (i32, i32) {
    %c0_i32 = arith.constant 0 : i32
    return %arg1, %arg0 : i32, i32
  }
  func.func @transform_1(%arg0: i32, %arg1: i32) -> (i32, i32) {
    %c0_i32 = arith.constant 0 : i32
    %c0_i32_0 = arith.constant 0 : i32
    return %c0_i32, %arg0 : i32, i32
  }
  func.func @transform_2(%arg0: i32, %arg1: i32) -> (i32, i32) {
    %c0_i32 = arith.constant 0 : i32
    return %arg1, %arg0 : i32, i32
  }
}

</mosaic_0001>

<bundles_post_ra>
// kernel: tpu_custom_call.1
= control target key start
LH: loop header
LB: loop body
LE: loop exit
PB: predicated region body
PF: predicated region fallthrough
CT: control target
= control target key end

     0   :  { %7 = vsyncpa [#allocation3], 0  ;;  %s173_s0 = inlined_call_operand.hbm [shape: f32[2,256], index: 0, kind: input, shape index: {}]   ;;  %s174_s1 = inlined_call_operand.hbm [shape: f32[1,256], index: 1, kind: input, shape index: {}]   ;;  %s175_s2 = inlined_call_operand.hbm [shape: f32[2,256], index: 2, kind: output, shape index: {}]  }
   0x1   :  { %8 = vsyncpa [#allocation6], 0 }
   0x2   :  { %9 = vsyncpa [#allocation4], 0  ;;  %s145_s9 = smov [#allocation2]   ;;  %s146_s11 = smov [#allocation5]  }
   0x3   :  { %s16_s10 = sshll.u32 %s145_s9, 4  ;;  %s26_s12 = sshll.u32 %s146_s11, 4  ;;  %s17_s10 = int_to_ptr.vmem [resolvable:$true] %s16_s10  ;;  %s27_s12 = int_to_ptr.vmem [resolvable:$true] %s26_s12 }
   0x4   :  { %s87_s13 = scalar_lea.vmem %s17_s10, 64  ;;  %p92_p1 = scmp.lt.s32.totalorder %s17_s10, %s17_s10 }
   0x5   :  { %p88_p0 = scmp.ne.s32.totalorder %s17_s10, %s87_s13  ;;  %p93_p2 = scmp.lt.s32.totalorder %s87_s13, %s87_s13 }
   0x7   :  { %p94_p3 = por %p93_p2, %p92_p1 }
   0x9   :  { %p95_p4 = pnand %p94_p3, %p88_p0 }
   0xb   :  { %98 = shalt.err (!%p95_p4)
}
   0xc   :  { %19 = dma.hbm_to_vmem [thread:$0]  %s173_s0, 64, %s17_s10, [#allocation3]  }
   0xd   :  { %s107_s16 = scalar_lea.vmem %s27_s12, 32  ;;  %p112_p6 = scmp.lt.s32.totalorder %s27_s12, %s27_s12 }
   0xe   :  { %p108_p5 = scmp.ne.s32.totalorder %s27_s12, %s107_s16  ;;  %p113_p7 = scmp.lt.s32.totalorder %s107_s16, %s107_s16 }
  0x10   :  { %p114_p8 = por %p113_p7, %p112_p6 }
  0x12   :  { %p115_p9 = pnand %p114_p8, %p108_p5 }
  0x14   :  { %118 = shalt.err (!%p115_p9)
}
  0x15   :  { %29 = dma.hbm_to_vmem [thread:$0]  %s174_s1, 32, %s27_s12, [#allocation6]  }
  0x16   :  { %139 = dma.done.wait [#allocation3], 64  }
  0x17   :  { %140 = vsyncadd [#allocation3], 4294967232 }
  0x18   :  { %141 = dma.done.wait [#allocation6], 32  }
  0x19   :  { %142 = vsyncadd [#allocation6], 4294967264  ;;  %v40_v0 = vlaneseq  ;;  %v147_v1 = vmov 1983009808   ;;  %v36_v7 = vld [vmem:[#allocation2] sm:$0xf] }
  0x1a   :  { %v50_v2 = vunpack.c.l.s4 %v147_v1  ;;  %v37_v8 = vld [vmem:[#allocation5] sm:$0x3]  ;;  %v38_v12 = vmul.f32 5.656854, %v36_v7  ;;  %s148_s0 = smov [#allocation7]  }
  0x1b   :  { %v41_v3 = vshrl.u32 %v40_v0, 7  ;;  %s65_s1 = sshll.u32 %s148_s0, 4  ;;  %s66_s1 = int_to_ptr.vmem [resolvable:$true] %s65_s1 }
  0x1c   :  { %v51_v6 = vunpack.c.0.s8 %v50_v2  ;;  %s119_s19 = scalar_lea.vmem %s66_s1, 64  ;;  %p124_p11 = scmp.lt.s32.totalorder %s66_s1, %s66_s1 }
  0x1d   :  { %v42_v4 = vsub.s32 0, %v41_v3  ;;  %v46_v5 = vsub.s32 1, %v41_v3  ;;  %p120_p10 = scmp.ne.s32.totalorder %s66_s1, %s119_s19  ;;  %p125_p12 = scmp.lt.s32.totalorder %s119_s19, %s119_s19 }
  0x1e   :  { %v54_v11 = vsub.s32 %v51_v6, %v41_v3 }
  0x1f   :  { %v43_v9 = vrot.slane %v37_v8, %v42_v4  ;;  %v47_v10 = vrot.slane %v37_v8, %v46_v5  ;;  %p126_p13 = por %p125_p12, %p124_p11 }
  0x21   :  { %v48_v13 = vcombine.low %v43_v9, %v47_v10  ;;  %p127_p0 = pnand %p126_p13, %p120_p10 }
  0x23   :  { %v55_v14 = vrot.slane %v48_v13, %v54_v11 }
  0x25   :  { %v57_v15 = vadd.f32 %v55_v14, %v38_v12 }
  0x27   :  { %58 = vst [vmem:[#allocation7] sm:$0xf] %v57_v15 }
  0x28   :  { %130 = shalt.err (!%p127_p0)
}
  0x29   :  { %68 = dma.vmem_to_hbm [thread:$0]  %s66_s1, 64, %s175_s2, [#allocation4]  }
  0x2a   :  { %143 = dma.done.wait [#allocation4], 64  }
  0x2b   :  { %144 = vsyncadd [#allocation4], 4294967232 }
  0x2c   :  { %72 = vsyncpa [#allocation3], 1 }
  0x2d   :  { %73 = vsyncpa [#allocation6], 1 }
  0x2e   :  { %74 = vsyncpa [#allocation4], 1 }

</bundles_post_ra>
